<compile_context>
chip_gen: v7x
topology: tpu7x:2x2x1
jax: 0.10.0
libtpu: 0.0.40
codegen_flags: <defaults>
</compile_context>

<pallas_src>
import functools
import math

import jax
import jax.numpy as jnp
from jax.experimental import pallas as pl
from jax.experimental.pallas import tpu as pltpu

# Flip to jnp.bfloat16 on v6e/v7x once S or d_model grow enough for MXU/DMA bytes to matter.
# Accumulation stays f32 via preferred_element_type; elementwise math stays f32 regardless.
MATMUL_DTYPE = jnp.float32


def _mm(a, w):
    return jnp.dot(a.astype(MATMUL_DTYPE), w.astype(MATMUL_DTYPE),
                   preferred_element_type=jnp.float32)


# ----------------------------------------------------------------------------- attention core
def _attn_one_seq(q_rows, k_rows, v_rows, head_mask, nhead, seq):
    """Multi-head attention for one (branch, batch) sequence without per-head slicing.

    q_rows/k_rows/v_rows: (S, D).  head_mask: (H*S, D); row h*S+i keeps only head h's
    channels.  Returns the head-concatenated attention output (S, D) BEFORE out_proj
    (out_proj is folded into the conv weight by the caller).  The 1/sqrt(head_dim) scale
    is already folded into the Q projection weights/bias.
    """
    H, S = nhead, seq
    # (H*S, D): H stacked copies of the query rows, each masked to its head's channels.
    q_rep = jnp.concatenate([q_rows] * H, axis=0) * head_mask
    # All heads' scores in one MXU push: s[h*S+i, j] = <q_i, k_j> over head-h channels only.
    s = jax.lax.dot_general(q_rep.astype(MATMUL_DTYPE), k_rows.astype(MATMUL_DTYPE),
                            (((1,), (1,)), ((), ())),
                            preferred_element_type=jnp.float32)          # (H*S, S)
    s = s - jnp.max(s, axis=-1, keepdims=True)
    p = jnp.exp(s)
    p = p / jnp.sum(p, axis=-1, keepdims=True)                            # exact softmax
    # All heads' PV in one push; keep each row-block's own head channels, then merge heads.
    o = _mm(p, v_rows) * head_mask                                        # (H*S, D)
    acc = o[0:S]
    for h in range(1, H):
        acc = acc + o[h * S:(h + 1) * S]
    return acc                                                            # (S, D)


# ----------------------------------------------------------------------------- fused layer kernel
def _luck_layer_kernel(x_ref, pos_ref, mask_ref,
                       wqk_ref, bqk_ref, wv_ref, bv_ref,
                       wc_ref, woc_ref, boc_ref, bns_ref, bnsh_ref,
                       out_ref, *, nhead, batch, seq, cross):
    B, S, H = batch, seq, nhead
    D = x_ref.shape[-1]
    BS = B * S

    x = x_ref[...]                       # (2*B*S, D) rows ordered (branch, batch, seq); no pos
    xp = x + pos_ref[...]                # with positional embedding (query / key source)
    head_mask = mask_ref[...]            # (H*S, D)

    # Shared projections over the full two-branch slab (one MXU push each).
    qk = _mm(xp, wqk_ref[...]) + bqk_ref[...]        # (2*B*S, 2D); Q half carries 1/sqrt(hd)
    q = qk[:, :D]
    k = qk[:, D:]
    v = _mm(x, wv_ref[...]) + bv_ref[...]            # value source = activations without pos
    xc = _mm(x, wc_ref[...])                         # residual path through the 1x1 conv

    # Per-sequence attention; the cross layer swaps the K/V branch (same batch index).
    outs = []
    for g in range(2):                               # branch: 0 = src, 1 = tgt
        kg = (1 - g) if cross else g
        for b in range(B):
            qs = slice(g * BS + b * S, g * BS + (b + 1) * S)
            ks = slice(kg * BS + b * S, kg * BS + (b + 1) * S)
            outs.append(_attn_one_seq(q[qs], k[ks], v[ks], head_mask, H, S))
    attn = jnp.concatenate(outs, axis=0)             # (2*B*S, D), heads merged, pre-out_proj

    # y = x - (attn @ wo + bo);  z = y @ wc  ==  x@wc - attn@(wo@wc) - bo@wc   (dropout = id)
    z = xc - _mm(attn, woc_ref[...]) - boc_ref[...]
    z = z * bns_ref[...] + bnsh_ref[...]             # folded eval-mode BatchNorm1d
    out_ref[...] = jnp.where(z >= 0, z, 0.2 * z)     # LeakyReLU(0.2)


# ----------------------------------------------------------------------------- wrapper
def _pack(a, b):
    """Two (S, B, D) seq-first tensors -> one (2*B*S, D) branch/batch-major slab."""
    S, B, D = a.shape
    x = jnp.stack([a, b], axis=0)            # (2, S, B, D)
    x = jnp.transpose(x, (0, 2, 1, 3))       # (2, B, S, D)   (fused by XLA with the stack)
    return x.reshape(2 * B * S, D)


def _unpack(out, S, B, D):
    out = out.reshape(2, B, S, D)
    out = jnp.transpose(out, (0, 2, 1, 3))   # (2, S, B, D)
    return out[0], out[1]


def _run_layer(src, tgt, params, nhead, src_pos, tgt_pos, cross):
    S, B, D = src.shape
    R = 2 * B * S
    x_all = _pack(src, tgt)
    pos_all = _pack(src_pos if src_pos is not None else jnp.zeros_like(src),
                    tgt_pos if tgt_pos is not None else jnp.zeros_like(tgt))

    def full_spec(shape):
        return pl.BlockSpec(shape, lambda i: (0,) * len(shape))

    kernel = functools.partial(_luck_layer_kernel,
                               nhead=nhead, batch=B, seq=S, cross=cross)
    args = (x_all, pos_all, params["head_mask"],
            params["wqk_t"], params["bqk"], params["wv_t"], params["bv"],
            params["wc_t"], params["woc_t"], params["boc"],
            params["bn_scale"], params["bn_shift"])

    out = pl.pallas_call(
        kernel,
        out_shape=jax.ShapeDtypeStruct((R, D), jnp.float32),
        grid=(1,),                                    # single step: both branches, whole batch
        in_specs=[full_spec(a.shape) for a in args],
        out_specs=full_spec((R, D)),
        compiler_params=pltpu.CompilerParams(dimension_semantics=("arbitrary",)),
    )(*args)

    return _unpack(out, S, B, D)


def luck_self_layer(src, tgt, params, nhead, src_pos=None, tgt_pos=None):
    """LuckSelfLayer forward (eval mode). Inputs/outputs are seq-first (S, B, D)."""
    return _run_layer(src, tgt, params, nhead, src_pos, tgt_pos, cross=False)


def luck_cross_layer(src, tgt, params, nhead, src_pos=None, tgt_pos=None):
    """LuckCrossLayer forward (eval mode). Inputs/outputs are seq-first (S, B, D)."""
    return _run_layer(src, tgt, params, nhead, src_pos, tgt_pos, cross=True)


# ----------------------------------------------------------------------------- params
def init_params(key, d_model, nhead, seq):
    """Deterministic synthetic parameters mirroring the PyTorch layer's shapes."""
    ks = jax.random.split(key, 5)
    D = d_model
    hd = D // nhead
    scale = 1.0 / math.sqrt(hd)

    in_proj_w = 0.1 * jax.random.normal(ks[0], (3 * D, D), jnp.float32)   # MHA in_proj
    in_proj_b = 0.1 * jax.random.normal(ks[1], (3 * D,), jnp.float32)
    out_proj_w = 0.1 * jax.random.normal(ks[2], (D, D), jnp.float32)      # MHA out_proj
    out_proj_b = 0.1 * jax.random.normal(ks[3], (D,), jnp.float32)
    conv_w = 0.1 * jax.random.normal(ks[4], (D, D, 1), jnp.float32)       # Conv1d, k=1, no bias

    # BatchNorm1d defaults (eval): gamma=1, beta=0, running_mean=0, running_var=1
    gamma = jnp.ones((D,), jnp.float32)
    beta = jnp.zeros((D,), jnp.float32)
    r_mean = jnp.zeros((D,), jnp.float32)
    r_var = jnp.ones((D,), jnp.float32)
    eps = 1e-5
    bn_scale = gamma / jnp.sqrt(r_var + eps)
    bn_shift = beta - r_mean * bn_scale

    wq_t = in_proj_w[:D].T
    wk_t = in_proj_w[D:2 * D].T
    wv_t = in_proj_w[2 * D:].T
    bq = in_proj_b[:D]
    bk = in_proj_b[D:2 * D]
    bv = in_proj_b[2 * D:]
    wo_t = out_proj_w.T
    bo = out_proj_b.reshape(1, D)
    wc_t = conv_w[:, :, 0].T

    # Head mask (H*S, D): row h*S+i keeps only head h's channel block.
    head_of_row = jnp.repeat(jnp.arange(nhead), seq)                      # (H*S,)
    chan_head = jnp.arange(D) // hd                                       # (D,)
    head_mask = (chan_head[None, :] == head_of_row[:, None]).astype(jnp.float32)

    return {
        # unfused copies (used by the pure-JAX reference)
        "wq_t": wq_t, "wk_t": wk_t, "wv_t": wv_t,
        "bq": bq.reshape(1, D), "bk": bk.reshape(1, D), "bv": bv.reshape(1, D),
        "wo_t": wo_t, "bo": bo, "wc_t": wc_t,
        "bn_scale": bn_scale.reshape(1, D), "bn_shift": bn_shift.reshape(1, D),
        # fused / pre-scaled / pre-folded forms used by the kernel
        "wqk_t": jnp.concatenate([wq_t * scale, wk_t], axis=1),            # (D, 2D)
        "bqk": jnp.concatenate([bq * scale, bk], axis=0).reshape(1, 2 * D),
        "woc_t": wo_t @ wc_t,                                              # out_proj folded into conv
        "boc": bo @ wc_t,
        "head_mask": head_mask,
    }


# ----------------------------------------------------------------------------- pure-JAX reference
def _ref_mha(q_in, k_in, v_in, p, nhead):
    S, B, D = q_in.shape
    hd = D // nhead
    qb = jnp.transpose(q_in, (1, 0, 2)) @ p["wq_t"] + p["bq"]
    kb = jnp.transpose(k_in, (1, 0, 2)) @ p["wk_t"] + p["bk"]
    vb = jnp.transpose(v_in, (1, 0, 2)) @ p["wv_t"] + p["bv"]

    def heads(t):
        return t.reshape(B, S, nhead, hd).transpose(0, 2, 1, 3)

    qh, kh, vh = heads(qb), heads(kb), heads(vb)
    s = jnp.einsum("bhqd,bhkd->bhqk", qh, kh) / math.sqrt(hd)
    a = jax.nn.softmax(s, axis=-1)
    o = jnp.einsum("bhqk,bhkd->bhqd", a, vh).transpose(0, 2, 1, 3).reshape(B, S, D)
    o = o @ p["wo_t"] + p["bo"]
    return jnp.transpose(o, (1, 0, 2))     # (S, B, D)


def _ref_post(x, attn, p):
    y = x - attn
    z = y @ p["wc_t"]
    z = z * p["bn_scale"] + p["bn_shift"]
    return jnp.where(z >= 0, z, 0.2 * z)


def ref_self_layer(src, tgt, p, nhead, src_pos, tgt_pos):
    sp, tp = src + src_pos, tgt + tgt_pos
    return (_ref_post(src, _ref_mha(sp, sp, src, p, nhead), p),
            _ref_post(tgt, _ref_mha(tp, tp, tgt, p, nhead), p))


def ref_cross_layer(src, tgt, p, nhead, src_pos, tgt_pos):
    sp, tp = src + src_pos, tgt + tgt_pos
    return (_ref_post(src, _ref_mha(sp, tp, tgt, p, nhead), p),
            _ref_post(tgt, _ref_mha(tp, sp, src, p, nhead), p))


# ----------------------------------------------------------------------------- main
if __name__ == "__main__":
    d_model, nhead = 32, 4
    S, B = 8, 2

    key = jax.random.PRNGKey(0)
    k_src, k_tgt, k_sp, k_tp, k_par = jax.random.split(key, 5)
    src = jax.random.normal(k_src, (S, B, d_model), jnp.float32)
    tgt = jax.random.normal(k_tgt, (S, B, d_model), jnp.float32)
    src_pos = 0.1 * jax.random.normal(k_sp, (S, B, d_model), jnp.float32)
    tgt_pos = 0.1 * jax.random.normal(k_tp, (S, B, d_model), jnp.float32)

    params = init_params(k_par, d_model, nhead, S)

    @jax.jit
    def run_self(src, tgt, src_pos, tgt_pos, params):
        return luck_self_layer(src, tgt, params, nhead, src_pos, tgt_pos)

    @jax.jit
    def run_cross(src, tgt, src_pos, tgt_pos, params):
        return luck_cross_layer(src, tgt, params, nhead, src_pos, tgt_pos)

    s_src, s_tgt = run_self(src, tgt, src_pos, tgt_pos, params)
    c_src, c_tgt = run_cross(src, tgt, src_pos, tgt_pos, params)
    jax.block_until_ready((s_src, s_tgt, c_src, c_tgt))

    # Pure-JAX reference checks (eval-mode semantics).
    rs_src, rs_tgt = ref_self_layer(src, tgt, params, nhead, src_pos, tgt_pos)
    rc_src, rc_tgt = ref_cross_layer(src, tgt, params, nhead, src_pos, tgt_pos)

    assert s_src.shape == (S, B, d_model) and s_tgt.shape == (S, B, d_model)
    assert c_src.shape == (S, B, d_model) and c_tgt.shape == (S, B, d_model)
    assert jnp.allclose(s_src, rs_src, rtol=1e-3, atol=1e-3)
    assert jnp.allclose(s_tgt, rs_tgt, rtol=1e-3, atol=1e-3)
    assert jnp.allclose(c_src, rc_src, rtol=1e-3, atol=1e-3)
    assert jnp.allclose(c_tgt, rc_tgt, rtol=1e-3, atol=1e-3)

    print("KERNEL_OK")
</pallas_src>

<mosaic_0001>
module attributes {stable_mosaic.version = 11 : i64} {
  func.func @_luck_layer_kernel(%arg0: i32, %arg1: memref<32x32xf32, #tpu.memory_space<vmem>>, %arg2: memref<32x32xf32, #tpu.memory_space<vmem>>, %arg3: memref<32x32xf32, #tpu.memory_space<vmem>>, %arg4: memref<32x64xf32, #tpu.memory_space<vmem>>, %arg5: memref<1x64xf32, #tpu.memory_space<vmem>>, %arg6: memref<32x32xf32, #tpu.memory_space<vmem>>, %arg7: memref<1x32xf32, #tpu.memory_space<vmem>>, %arg8: memref<32x32xf32, #tpu.memory_space<vmem>>, %arg9: memref<32x32xf32, #tpu.memory_space<vmem>>, %arg10: memref<1x32xf32, #tpu.memory_space<vmem>>, %arg11: memref<1x32xf32, #tpu.memory_space<vmem>>, %arg12: memref<1x32xf32, #tpu.memory_space<vmem>>, %arg13: memref<32x32xf32, #tpu.memory_space<vmem>>) attributes {dimension_semantics = [#tpu.dimension_semantics<arbitrary>], iteration_bounds = array<i64: 1>, scalar_prefetch = 0 : i64, scratch_operands = 0 : i64, tpu.core_type = #tpu.core_type<tc>, window_params = [{pipeline_mode = #tpu.pipeline_mode<synchronous>, transform_indices = @transform_0, window_bounds = array<i64: 32, 32>}, {pipeline_mode = #tpu.pipeline_mode<synchronous>, transform_indices = @transform_1, window_bounds = array<i64: 32, 32>}, {pipeline_mode = #tpu.pipeline_mode<synchronous>, transform_indices = @transform_2, window_bounds = array<i64: 32, 32>}, {pipeline_mode = #tpu.pipeline_mode<synchronous>, transform_indices = @transform_3, window_bounds = array<i64: 32, 64>}, {pipeline_mode = #tpu.pipeline_mode<synchronous>, transform_indices = @transform_4, window_bounds = array<i64: 1, 64>}, {pipeline_mode = #tpu.pipeline_mode<synchronous>, transform_indices = @transform_5, window_bounds = array<i64: 32, 32>}, {pipeline_mode = #tpu.pipeline_mode<synchronous>, transform_indices = @transform_6, window_bounds = array<i64: 1, 32>}, {pipeline_mode = #tpu.pipeline_mode<synchronous>, transform_indices = @transform_7, window_bounds = array<i64: 32, 32>}, {pipeline_mode = #tpu.pipeline_mode<synchronous>, transform_indices = @transform_8, window_bounds = array<i64: 32, 32>}, {pipeline_mode = #tpu.pipeline_mode<synchronous>, transform_indices = @transform_9, window_bounds = array<i64: 1, 32>}, {pipeline_mode = #tpu.pipeline_mode<synchronous>, transform_indices = @transform_10, window_bounds = array<i64: 1, 32>}, {pipeline_mode = #tpu.pipeline_mode<synchronous>, transform_indices = @transform_11, window_bounds = array<i64: 1, 32>}, {pipeline_mode = #tpu.pipeline_mode<synchronous>, transform_indices = @transform_12, window_bounds = array<i64: 32, 32>}]} {
    %c0 = arith.constant 0 : index
    %c0_0 = arith.constant 0 : index
    %0 = vector.load %arg1[%c0, %c0_0] : memref<32x32xf32, #tpu.memory_space<vmem>>, vector<32x32xf32>
    %c0_1 = arith.constant 0 : index
    %c0_2 = arith.constant 0 : index
    %1 = vector.load %arg2[%c0_1, %c0_2] : memref<32x32xf32, #tpu.memory_space<vmem>>, vector<32x32xf32>
    %2 = arith.addf %0, %1 : vector<32x32xf32>
    %c0_3 = arith.constant 0 : index
    %c0_4 = arith.constant 0 : index
    %3 = vector.load %arg3[%c0_3, %c0_4] : memref<32x32xf32, #tpu.memory_space<vmem>>, vector<32x32xf32>
    %c0_5 = arith.constant 0 : index
    %c0_6 = arith.constant 0 : index
    %4 = vector.load %arg4[%c0_5, %c0_6] : memref<32x64xf32, #tpu.memory_space<vmem>>, vector<32x64xf32>
    %cst = arith.constant dense<0.000000e+00> : vector<32x64xf32>
    %5 = tpu.matmul %2, %4, %cst {dimension_numbers = #tpu.dot_dimension_numbers<[1], [0], [0], [1], [0, 0, 1, 1], [], []>} : vector<32x32xf32>, vector<32x64xf32>, vector<32x64xf32> -> vector<32x64xf32>
    %c0_7 = arith.constant 0 : index
    %c0_8 = arith.constant 0 : index
    %6 = vector.load %arg5[%c0_7, %c0_8] : memref<1x64xf32, #tpu.memory_space<vmem>>, vector<1x64xf32>
    %7 = vector.broadcast %6 : vector<1x64xf32> to vector<32x64xf32>
    %8 = arith.addf %5, %7 : vector<32x64xf32>
    %9 = vector.extract_strided_slice %8 {offsets = [0, 0], sizes = [32, 32], strides = [1, 1]} : vector<32x64xf32> to vector<32x32xf32>
    %10 = vector.extract_strided_slice %8 {offsets = [0, 32], sizes = [32, 32], strides = [1, 1]} : vector<32x64xf32> to vector<32x32xf32>
    %c0_9 = arith.constant 0 : index
    %c0_10 = arith.constant 0 : index
    %11 = vector.load %arg6[%c0_9, %c0_10] : memref<32x32xf32, #tpu.memory_space<vmem>>, vector<32x32xf32>
    %cst_11 = arith.constant dense<0.000000e+00> : vector<32x32xf32>
    %12 = tpu.matmul %0, %11, %cst_11 {dimension_numbers = #tpu.dot_dimension_numbers<[1], [0], [0], [1], [0, 0, 1, 1], [], []>} : vector<32x32xf32>, vector<32x32xf32>, vector<32x32xf32> -> vector<32x32xf32>
    %c0_12 = arith.constant 0 : index
    %c0_13 = arith.constant 0 : index
    %13 = vector.load %arg7[%c0_12, %c0_13] : memref<1x32xf32, #tpu.memory_space<vmem>>, vector<1x32xf32>
    %14 = vector.broadcast %13 : vector<1x32xf32> to vector<32x32xf32>
    %15 = arith.addf %12, %14 : vector<32x32xf32>
    %c0_14 = arith.constant 0 : index
    %c0_15 = arith.constant 0 : index
    %16 = vector.load %arg8[%c0_14, %c0_15] : memref<32x32xf32, #tpu.memory_space<vmem>>, vector<32x32xf32>
    %cst_16 = arith.constant dense<0.000000e+00> : vector<32x32xf32>
    %17 = tpu.matmul %0, %16, %cst_16 {dimension_numbers = #tpu.dot_dimension_numbers<[1], [0], [0], [1], [0, 0, 1, 1], [], []>} : vector<32x32xf32>, vector<32x32xf32>, vector<32x32xf32> -> vector<32x32xf32>
    %18 = vector.extract_strided_slice %9 {offsets = [0, 0], sizes = [8, 32], strides = [1, 1]} : vector<32x32xf32> to vector<8x32xf32>
    %19 = vector.extract_strided_slice %10 {offsets = [0, 0], sizes = [8, 32], strides = [1, 1]} : vector<32x32xf32> to vector<8x32xf32>
    %20 = vector.extract_strided_slice %15 {offsets = [0, 0], sizes = [8, 32], strides = [1, 1]} : vector<32x32xf32> to vector<8x32xf32>
    %21 = tpu.concatenate %18, %18, %18, %18 in 0 : vector<8x32xf32>, vector<8x32xf32>, vector<8x32xf32>, vector<8x32xf32> -> vector<32x32xf32>
    %22 = arith.mulf %21, %3 : vector<32x32xf32>
    %cst_17 = arith.constant dense<0.000000e+00> : vector<32x8xf32>
    %23 = tpu.matmul %22, %19, %cst_17 {dimension_numbers = #tpu.dot_dimension_numbers<[1], [1], [0], [0], [0, 0, 1, 0], [], []>} : vector<32x32xf32>, vector<8x32xf32>, vector<32x8xf32> -> vector<32x8xf32>
    %cst_18 = arith.constant dense<0xFF800000> : vector<32xf32>
    %24 = vector.multi_reduction <maximumf>, %23, %cst_18 [1] : vector<32x8xf32> to vector<32xf32>
    %25 = vector.shape_cast %24 : vector<32xf32> to vector<32x1xf32>
    %26 = vector.broadcast %25 : vector<32x1xf32> to vector<32x8xf32>
    %27 = arith.subf %23, %26 : vector<32x8xf32>
    %28 = math.exp %27 : vector<32x8xf32>
    %cst_19 = arith.constant dense<0.000000e+00> : vector<32xf32>
    %29 = vector.multi_reduction <add>, %28, %cst_19 [1] : vector<32x8xf32> to vector<32xf32>
    %30 = vector.shape_cast %29 : vector<32xf32> to vector<32x1xf32>
    %31 = vector.broadcast %30 : vector<32x1xf32> to vector<32x8xf32>
    %32 = arith.divf %28, %31 : vector<32x8xf32>
    %cst_20 = arith.constant dense<0.000000e+00> : vector<32x32xf32>
    %33 = tpu.matmul %32, %20, %cst_20 {dimension_numbers = #tpu.dot_dimension_numbers<[1], [0], [0], [1], [0, 0, 1, 1], [], []>} : vector<32x8xf32>, vector<8x32xf32>, vector<32x32xf32> -> vector<32x32xf32>
    %34 = arith.mulf %33, %3 : vector<32x32xf32>
    %35 = vector.extract_strided_slice %34 {offsets = [0, 0], sizes = [8, 32], strides = [1, 1]} : vector<32x32xf32> to vector<8x32xf32>
    %36 = vector.extract_strided_slice %34 {offsets = [8, 0], sizes = [8, 32], strides = [1, 1]} : vector<32x32xf32> to vector<8x32xf32>
    %37 = arith.addf %35, %36 : vector<8x32xf32>
    %38 = vector.extract_strided_slice %34 {offsets = [16, 0], sizes = [8, 32], strides = [1, 1]} : vector<32x32xf32> to vector<8x32xf32>
    %39 = arith.addf %37, %38 : vector<8x32xf32>
    %40 = vector.extract_strided_slice %34 {offsets = [24, 0], sizes = [8, 32], strides = [1, 1]} : vector<32x32xf32> to vector<8x32xf32>
    %41 = arith.addf %39, %40 : vector<8x32xf32>
    %42 = vector.extract_strided_slice %9 {offsets = [8, 0], sizes = [8, 32], strides = [1, 1]} : vector<32x32xf32> to vector<8x32xf32>
    %43 = vector.extract_strided_slice %10 {offsets = [8, 0], sizes = [8, 32], strides = [1, 1]} : vector<32x32xf32> to vector<8x32xf32>
    %44 = vector.extract_strided_slice %15 {offsets = [8, 0], sizes = [8, 32], strides = [1, 1]} : vector<32x32xf32> to vector<8x32xf32>
    %45 = tpu.concatenate %42, %42, %42, %42 in 0 : vector<8x32xf32>, vector<8x32xf32>, vector<8x32xf32>, vector<8x32xf32> -> vector<32x32xf32>
    %46 = arith.mulf %45, %3 : vector<32x32xf32>
    %cst_21 = arith.constant dense<0.000000e+00> : vector<32x8xf32>
    %47 = tpu.matmul %46, %43, %cst_21 {dimension_numbers = #tpu.dot_dimension_numbers<[1], [1], [0], [0], [0, 0, 1, 0], [], []>} : vector<32x32xf32>, vector<8x32xf32>, vector<32x8xf32> -> vector<32x8xf32>
    %cst_22 = arith.constant dense<0xFF800000> : vector<32xf32>
    %48 = vector.multi_reduction <maximumf>, %47, %cst_22 [1] : vector<32x8xf32> to vector<32xf32>
    %49 = vector.shape_cast %48 : vector<32xf32> to vector<32x1xf32>
    %50 = vector.broadcast %49 : vector<32x1xf32> to vector<32x8xf32>
    %51 = arith.subf %47, %50 : vector<32x8xf32>
    %52 = math.exp %51 : vector<32x8xf32>
    %cst_23 = arith.constant dense<0.000000e+00> : vector<32xf32>
    %53 = vector.multi_reduction <add>, %52, %cst_23 [1] : vector<32x8xf32> to vector<32xf32>
    %54 = vector.shape_cast %53 : vector<32xf32> to vector<32x1xf32>
    %55 = vector.broadcast %54 : vector<32x1xf32> to vector<32x8xf32>
    %56 = arith.divf %52, %55 : vector<32x8xf32>
    %cst_24 = arith.constant dense<0.000000e+00> : vector<32x32xf32>
    %57 = tpu.matmul %56, %44, %cst_24 {dimension_numbers = #tpu.dot_dimension_numbers<[1], [0], [0], [1], [0, 0, 1, 1], [], []>} : vector<32x8xf32>, vector<8x32xf32>, vector<32x32xf32> -> vector<32x32xf32>
    %58 = arith.mulf %57, %3 : vector<32x32xf32>
    %59 = vector.extract_strided_slice %58 {offsets = [0, 0], sizes = [8, 32], strides = [1, 1]} : vector<32x32xf32> to vector<8x32xf32>
    %60 = vector.extract_strided_slice %58 {offsets = [8, 0], sizes = [8, 32], strides = [1, 1]} : vector<32x32xf32> to vector<8x32xf32>
    %61 = arith.addf %59, %60 : vector<8x32xf32>
    %62 = vector.extract_strided_slice %58 {offsets = [16, 0], sizes = [8, 32], strides = [1, 1]} : vector<32x32xf32> to vector<8x32xf32>
    %63 = arith.addf %61, %62 : vector<8x32xf32>
    %64 = vector.extract_strided_slice %58 {offsets = [24, 0], sizes = [8, 32], strides = [1, 1]} : vector<32x32xf32> to vector<8x32xf32>
    %65 = arith.addf %63, %64 : vector<8x32xf32>
    %66 = vector.extract_strided_slice %9 {offsets = [16, 0], sizes = [8, 32], strides = [1, 1]} : vector<32x32xf32> to vector<8x32xf32>
    %67 = vector.extract_strided_slice %10 {offsets = [16, 0], sizes = [8, 32], strides = [1, 1]} : vector<32x32xf32> to vector<8x32xf32>
    %68 = vector.extract_strided_slice %15 {offsets = [16, 0], sizes = [8, 32], strides = [1, 1]} : vector<32x32xf32> to vector<8x32xf32>
    %69 = tpu.concatenate %66, %66, %66, %66 in 0 : vector<8x32xf32>, vector<8x32xf32>, vector<8x32xf32>, vector<8x32xf32> -> vector<32x32xf32>
    %70 = arith.mulf %69, %3 : vector<32x32xf32>
    %cst_25 = arith.constant dense<0.000000e+00> : vector<32x8xf32>
    %71 = tpu.matmul %70, %67, %cst_25 {dimension_numbers = #tpu.dot_dimension_numbers<[1], [1], [0], [0], [0, 0, 1, 0], [], []>} : vector<32x32xf32>, vector<8x32xf32>, vector<32x8xf32> -> vector<32x8xf32>
    %cst_26 = arith.constant dense<0xFF800000> : vector<32xf32>
    %72 = vector.multi_reduction <maximumf>, %71, %cst_26 [1] : vector<32x8xf32> to vector<32xf32>
    %73 = vector.shape_cast %72 : vector<32xf32> to vector<32x1xf32>
    %74 = vector.broadcast %73 : vector<32x1xf32> to vector<32x8xf32>
    %75 = arith.subf %71, %74 : vector<32x8xf32>
    %76 = math.exp %75 : vector<32x8xf32>
    %cst_27 = arith.constant dense<0.000000e+00> : vector<32xf32>
    %77 = vector.multi_reduction <add>, %76, %cst_27 [1] : vector<32x8xf32> to vector<32xf32>
    %78 = vector.shape_cast %77 : vector<32xf32> to vector<32x1xf32>
    %79 = vector.broadcast %78 : vector<32x1xf32> to vector<32x8xf32>
    %80 = arith.divf %76, %79 : vector<32x8xf32>
    %cst_28 = arith.constant dense<0.000000e+00> : vector<32x32xf32>
    %81 = tpu.matmul %80, %68, %cst_28 {dimension_numbers = #tpu.dot_dimension_numbers<[1], [0], [0], [1], [0, 0, 1, 1], [], []>} : vector<32x8xf32>, vector<8x32xf32>, vector<32x32xf32> -> vector<32x32xf32>
    %82 = arith.mulf %81, %3 : vector<32x32xf32>
    %83 = vector.extract_strided_slice %82 {offsets = [0, 0], sizes = [8, 32], strides = [1, 1]} : vector<32x32xf32> to vector<8x32xf32>
    %84 = vector.extract_strided_slice %82 {offsets = [8, 0], sizes = [8, 32], strides = [1, 1]} : vector<32x32xf32> to vector<8x32xf32>
    %85 = arith.addf %83, %84 : vector<8x32xf32>
    %86 = vector.extract_strided_slice %82 {offsets = [16, 0], sizes = [8, 32], strides = [1, 1]} : vector<32x32xf32> to vector<8x32xf32>
    %87 = arith.addf %85, %86 : vector<8x32xf32>
    %88 = vector.extract_strided_slice %82 {offsets = [24, 0], sizes = [8, 32], strides = [1, 1]} : vector<32x32xf32> to vector<8x32xf32>
    %89 = arith.addf %87, %88 : vector<8x32xf32>
    %90 = vector.extract_strided_slice %9 {offsets = [24, 0], sizes = [8, 32], strides = [1, 1]} : vector<32x32xf32> to vector<8x32xf32>
    %91 = vector.extract_strided_slice %10 {offsets = [24, 0], sizes = [8, 32], strides = [1, 1]} : vector<32x32xf32> to vector<8x32xf32>
    %92 = vector.extract_strided_slice %15 {offsets = [24, 0], sizes = [8, 32], strides = [1, 1]} : vector<32x32xf32> to vector<8x32xf32>
    %93 = tpu.concatenate %90, %90, %90, %90 in 0 : vector<8x32xf32>, vector<8x32xf32>, vector<8x32xf32>, vector<8x32xf32> -> vector<32x32xf32>
    %94 = arith.mulf %93, %3 : vector<32x32xf32>
    %cst_29 = arith.constant dense<0.000000e+00> : vector<32x8xf32>
    %95 = tpu.matmul %94, %91, %cst_29 {dimension_numbers = #tpu.dot_dimension_numbers<[1], [1], [0], [0], [0, 0, 1, 0], [], []>} : vector<32x32xf32>, vector<8x32xf32>, vector<32x8xf32> -> vector<32x8xf32>
    %cst_30 = arith.constant dense<0xFF800000> : vector<32xf32>
    %96 = vector.multi_reduction <maximumf>, %95, %cst_30 [1] : vector<32x8xf32> to vector<32xf32>
    %97 = vector.shape_cast %96 : vector<32xf32> to vector<32x1xf32>
    %98 = vector.broadcast %97 : vector<32x1xf32> to vector<32x8xf32>
    %99 = arith.subf %95, %98 : vector<32x8xf32>
    %100 = math.exp %99 : vector<32x8xf32>
    %cst_31 = arith.constant dense<0.000000e+00> : vector<32xf32>
    %101 = vector.multi_reduction <add>, %100, %cst_31 [1] : vector<32x8xf32> to vector<32xf32>
    %102 = vector.shape_cast %101 : vector<32xf32> to vector<32x1xf32>
    %103 = vector.broadcast %102 : vector<32x1xf32> to vector<32x8xf32>
    %104 = arith.divf %100, %103 : vector<32x8xf32>
    %cst_32 = arith.constant dense<0.000000e+00> : vector<32x32xf32>
    %105 = tpu.matmul %104, %92, %cst_32 {dimension_numbers = #tpu.dot_dimension_numbers<[1], [0], [0], [1], [0, 0, 1, 1], [], []>} : vector<32x8xf32>, vector<8x32xf32>, vector<32x32xf32> -> vector<32x32xf32>
    %106 = arith.mulf %105, %3 : vector<32x32xf32>
    %107 = vector.extract_strided_slice %106 {offsets = [0, 0], sizes = [8, 32], strides = [1, 1]} : vector<32x32xf32> to vector<8x32xf32>
    %108 = vector.extract_strided_slice %106 {offsets = [8, 0], sizes = [8, 32], strides = [1, 1]} : vector<32x32xf32> to vector<8x32xf32>
    %109 = arith.addf %107, %108 : vector<8x32xf32>
    %110 = vector.extract_strided_slice %106 {offsets = [16, 0], sizes = [8, 32], strides = [1, 1]} : vector<32x32xf32> to vector<8x32xf32>
    %111 = arith.addf %109, %110 : vector<8x32xf32>
    %112 = vector.extract_strided_slice %106 {offsets = [24, 0], sizes = [8, 32], strides = [1, 1]} : vector<32x32xf32> to vector<8x32xf32>
    %113 = arith.addf %111, %112 : vector<8x32xf32>
    %114 = tpu.concatenate %41, %65, %89, %113 in 0 : vector<8x32xf32>, vector<8x32xf32>, vector<8x32xf32>, vector<8x32xf32> -> vector<32x32xf32>
    %c0_33 = arith.constant 0 : index
    %c0_34 = arith.constant 0 : index
    %115 = vector.load %arg9[%c0_33, %c0_34] : memref<32x32xf32, #tpu.memory_space<vmem>>, vector<32x32xf32>
    %cst_35 = arith.constant dense<0.000000e+00> : vector<32x32xf32>
    %116 = tpu.matmul %114, %115, %cst_35 {dimension_numbers = #tpu.dot_dimension_numbers<[1], [0], [0], [1], [0, 0, 1, 1], [], []>} : vector<32x32xf32>, vector<32x32xf32>, vector<32x32xf32> -> vector<32x32xf32>
    %117 = arith.subf %17, %116 : vector<32x32xf32>
    %c0_36 = arith.constant 0 : index
    %c0_37 = arith.constant 0 : index
    %118 = vector.load %arg10[%c0_36, %c0_37] : memref<1x32xf32, #tpu.memory_space<vmem>>, vector<1x32xf32>
    %119 = vector.broadcast %118 : vector<1x32xf32> to vector<32x32xf32>
    %120 = arith.subf %117, %119 : vector<32x32xf32>
    %c0_38 = arith.constant 0 : index
    %c0_39 = arith.constant 0 : index
    %121 = vector.load %arg11[%c0_38, %c0_39] : memref<1x32xf32, #tpu.memory_space<vmem>>, vector<1x32xf32>
    %122 = vector.broadcast %121 : vector<1x32xf32> to vector<32x32xf32>
    %123 = arith.mulf %120, %122 : vector<32x32xf32>
    %c0_40 = arith.constant 0 : index
    %c0_41 = arith.constant 0 : index
    %124 = vector.load %arg12[%c0_40, %c0_41] : memref<1x32xf32, #tpu.memory_space<vmem>>, vector<1x32xf32>
    %125 = vector.broadcast %124 : vector<1x32xf32> to vector<32x32xf32>
    %126 = arith.addf %123, %125 : vector<32x32xf32>
    %cst_42 = arith.constant 0.000000e+00 : f32
    %127 = vector.broadcast %cst_42 : f32 to vector<32x32xf32>
    %128 = arith.cmpf oge, %126, %127 : vector<32x32xf32>
    %cst_43 = arith.constant 2.000000e-01 : f32
    %129 = vector.broadcast %cst_43 : f32 to vector<32x32xf32>
    %130 = arith.mulf %129, %126 : vector<32x32xf32>
    %131 = arith.select %128, %126, %130 : vector<32x32xi1>, vector<32x32xf32>
    %c0_44 = arith.constant 0 : index
    %c0_45 = arith.constant 0 : index
    %132 = vector.load %arg13[%c0_44, %c0_45] : memref<32x32xf32, #tpu.memory_space<vmem>>, vector<32x32xf32>
    tpu.vector_store %arg13[%c0_44, %c0_45], %131 {strides = array<i32>} : memref<32x32xf32, #tpu.memory_space<vmem>>, vector<32x32xf32>,
    return
  }
  func.func @transform_0(%arg0: i32) -> (i32, i32) {
    %c0_i32 = arith.constant 0 : i32
    %c0_i32_0 = arith.constant 0 : i32
    %c0_i32_1 = arith.constant 0 : i32
    return %c0_i32, %c0_i32_0 : i32, i32
  }
  func.func @transform_1(%arg0: i32) -> (i32, i32) {
    %c0_i32 = arith.constant 0 : i32
    %c0_i32_0 = arith.constant 0 : i32
    %c0_i32_1 = arith.constant 0 : i32
    return %c0_i32, %c0_i32_0 : i32, i32
  }
  func.func @transform_2(%arg0: i32) -> (i32, i32) {
    %c0_i32 = arith.constant 0 : i32
    %c0_i32_0 = arith.constant 0 : i32
    %c0_i32_1 = arith.constant 0 : i32
    return %c0_i32, %c0_i32_0 : i32, i32
  }
  func.func @transform_3(%arg0: i32) -> (i32, i32) {
    %c0_i32 = arith.constant 0 : i32
    %c0_i32_0 = arith.constant 0 : i32
    %c0_i32_1 = arith.constant 0 : i32
    return %c0_i32, %c0_i32_0 : i32, i32
  }
  func.func @transform_4(%arg0: i32) -> (i32, i32) {
    %c0_i32 = arith.constant 0 : i32
    %c0_i32_0 = arith.constant 0 : i32
    %c0_i32_1 = arith.constant 0 : i32
    return %c0_i32, %c0_i32_0 : i32, i32
  }
  func.func @transform_5(%arg0: i32) -> (i32, i32) {
    %c0_i32 = arith.constant 0 : i32
    %c0_i32_0 = arith.constant 0 : i32
    %c0_i32_1 = arith.constant 0 : i32
    return %c0_i32, %c0_i32_0 : i32, i32
  }
  func.func @transform_6(%arg0: i32) -> (i32, i32) {
    %c0_i32 = arith.constant 0 : i32
    %c0_i32_0 = arith.constant 0 : i32
    %c0_i32_1 = arith.constant 0 : i32
    return %c0_i32, %c0_i32_0 : i32, i32
  }
  func.func @transform_7(%arg0: i32) -> (i32, i32) {
    %c0_i32 = arith.constant 0 : i32
    %c0_i32_0 = arith.constant 0 : i32
    %c0_i32_1 = arith.constant 0 : i32
    return %c0_i32, %c0_i32_0 : i32, i32
  }
  func.func @transform_8(%arg0: i32) -> (i32, i32) {
    %c0_i32 = arith.constant 0 : i32
    %c0_i32_0 = arith.constant 0 : i32
    %c0_i32_1 = arith.constant 0 : i32
    return %c0_i32, %c0_i32_0 : i32, i32
  }
  func.func @transform_9(%arg0: i32) -> (i32, i32) {
    %c0_i32 = arith.constant 0 : i32
    %c0_i32_0 = arith.constant 0 : i32
    %c0_i32_1 = arith.constant 0 : i32
    return %c0_i32, %c0_i32_0 : i32, i32
  }
  func.func @transform_10(%arg0: i32) -> (i32, i32) {
    %c0_i32 = arith.constant 0 : i32
    %c0_i32_0 = arith.constant 0 : i32
    %c0_i32_1 = arith.constant 0 : i32
    return %c0_i32, %c0_i32_0 : i32, i32
  }
  func.func @transform_11(%arg0: i32) -> (i32, i32) {
    %c0_i32 = arith.constant 0 : i32
    %c0_i32_0 = arith.constant 0 : i32
    %c0_i32_1 = arith.constant 0 : i32
    return %c0_i32, %c0_i32_0 : i32, i32
  }
  func.func @transform_12(%arg0: i32) -> (i32, i32) {
    %c0_i32 = arith.constant 0 : i32
    %c0_i32_0 = arith.constant 0 : i32
    %c0_i32_1 = arith.constant 0 : i32
    return %c0_i32, %c0_i32_0 : i32, i32
  }
}

</mosaic_0001>

<bundles_post_ra>
// kernel: run_self.1
= control target key start
LH: loop header
LB: loop body
LE: loop exit
PB: predicated region body
PF: predicated region fallthrough
CT: control target
= control target key end

     0   :  { %vm68_vm0 = vcmask 261120   ;;  %vm469_vm1 = vcmask 64512   ;;  %s2345_s3 = inlined_call_operand.vmem [shape: f32[32,64], index: 3, kind: input, shape index: {}]   ;;  %s2346_s0 = inlined_call_operand.vmem [shape: f32[32,32], index: 0, kind: input, shape index: {}]   ;;  %s2347_s1 = inlined_call_operand.vmem [shape: f32[32,32], index: 1, kind: input, shape index: {}]   ;;  %s2348_s5 = inlined_call_operand.vmem [shape: f32[32,32], index: 5, kind: input, shape index: {}]   ;;  %s2349_s4 = inlined_call_operand.vmem [shape: f32[1,64], index: 4, kind: input, shape index: {}]   ;;  %s2350_s2 = inlined_call_operand.vmem [shape: f32[32,32], index: 2, kind: input, shape index: {}]   ;;  %s2351_s7 = inlined_call_operand.vmem [shape: f32[32,32], index: 7, kind: input, shape index: {}]   ;;  %s2352_s6 = inlined_call_operand.vmem [shape: f32[1,32], index: 6, kind: input, shape index: {}]   ;;  %s2353_s8 = inlined_call_operand.vmem [shape: f32[32,32], index: 8, kind: input, shape index: {}]   ;;  %s2354_s9 = inlined_call_operand.vmem [shape: f32[1,32], index: 9, kind: input, shape index: {}]   ;;  %s2355_s10 = inlined_call_operand.vmem [shape: f32[1,32], index: 10, kind: input, shape index: {}]   ;;  %s2356_s11 = inlined_call_operand.vmem [shape: f32[1,32], index: 11, kind: input, shape index: {}]   ;;  %s2357_s12 = inlined_call_operand.vmem [shape: f32[32,32], index: 12, kind: output, shape index: {}]  }
   0x1   :  { %v57_v0 = vld [vmem:[%s2345_s3] sm:$0xff]  ;;  %v58_v1 = vld [vmem:[%s2345_s3 + $0x8] sm:$0xff]  ;;  %v59_v2 = vld [vmem:[%s2345_s3 + $0x10] sm:$0xff] }
   0x2   :  { %v1787_v3 = vpack.c.bf16 %v58_v1, %v57_v0  ;;  %v60_v4 = vld [vmem:[%s2345_s3 + $0x18] sm:$0xff]  ;;  %v41_v5 = vld [vmem:[%s2346_s0] sm:$0xff]  ;;  %v1972_v9 = vld [vmem:[%s2346_s0 + $0x8] sm:$0xff]  ;;  %s1884_s3 = smov 96  }
   0x3   :  { %v45_v6 = vld [vmem:[%s2347_s1] sm:$0xff]  ;;  %v1791_v7 = vpack.c.bf16 %v60_v4, %v59_v2  ;;  %1689 = vmatprep.mubr.msk.f32.mxu1 %vm68_vm0, %v41_v5  ;;  %v46_v10 = vld [vmem:[%s2347_s1 + $0x8] sm:$0xff]  ;;  %v168_v13 = vld [vmem:[%s2348_s5 + $0x10] sm:$0xff] }
   0x4   :  { %v49_v8 = vadd.f32 %v45_v6, %v41_v5  ;;  %1788 = vmatprep.subr.bf16.mxu0 %v1787_v3  ;;  %v166_v11 = vld [vmem:[%s2348_s5] sm:$0xff]  ;;  %v167_v12 = vld [vmem:[%s2348_s5 + $0x8] sm:$0xff]  ;;  %v1990_v14 = vld [vmem:[%s2346_s0 + $0x10] sm:$0xff]  ;;  %v50_v19 = vadd.f32 %v46_v10, %v1972_v9 }
   0x5   :  { %1790 = vmatpush3.bf16.msra.mxu0 %v1787_v3  ;;  %v47_v15 = vld [vmem:[%s2347_s1 + $0x10] sm:$0xff]  ;;  %v1795_v16 = vpack.c.bf16 %v167_v12, %v166_v11  ;;  %v169_v17 = vld [vmem:[%s2348_s5 + $0x18] sm:$0xff]  ;;  %v1538_v24 = vld [vmem:[%s2349_s4] ss:$0 sm:$0xff] }
   0x6   :  { %1675 = vmatprep.mubr.msk.f32.mxu0 %vm68_vm0, %v49_v8  ;;  %1792 = vmatprep.subr.bf16.mxu0 %v1791_v7  ;;  %v1799_v18 = vpack.c.bf16 %v169_v17, %v168_v13  ;;  %v51_v20 = vadd.f32 %v47_v15, %v1990_v14  ;;  %v44_v21 = vld [vmem:[%s2346_s0 + $0x18] sm:$0xff]  ;;  %v2021_v27 = vld [vmem:[%s2350_s2] sm:$0xff]  ;;  %v275_v37 = vld [vmem:[%s2351_s7 + $0x8] sm:$0xff] }
   0x7   :  { %1796 = vmatprep.subr.bf16.mxu1 %v1795_v16  ;;  %v48_v22 = vld [vmem:[%s2347_s1 + $0x18] sm:$0xff]  ;;  %v274_v36 = vld [vmem:[%s2351_s7] sm:$0xff]  ;;  %v276_v41 = vld [vmem:[%s2351_s7 + $0x10] sm:$0xff] }
   0x8   :  { %1798 = vmatpush3.bf16.msra.mxu1 %v1795_v16  ;;  %v52_v23 = vadd.f32 %v48_v22, %v44_v21  ;;  %v1803_v39 = vpack.c.bf16 %v275_v37, %v274_v36  ;;  %v1543_v40 = vld [vmem:[%s2352_s6] ss:$0 sm:$0xff]  ;;  %v277_v42 = vld [vmem:[%s2351_s7 + $0x18] sm:$0xff]  ;;  %v2061_v50 = vld [vmem:[%s2350_s2 + $0x8] sm:$0xff] }
   0x9   :  { %1794 = vmatpush3.bf16.msra.mxu0 %v1791_v7  ;;  %1800 = vmatprep.subr.bf16.mxu1 %v1799_v18  ;;  %v1807_v44 = vpack.c.bf16 %v277_v42, %v276_v41  ;;  %v2067_v52 = vld [vmem:[%s2350_s2 + $0x10] sm:$0xff]  ;;  %v2075_v56 = vld [vmem:[%s2350_s2 + $0x18] sm:$0xff] }
   0xa   :  { %1804 = vmatprep.subr.bf16.mxu0 %v1803_v39 }
   0xc   :  { %1676 = vmatmul.mubr.msk.f32.vlgmr.msra.gmra.mrb[0].mxu0 %vm68_vm0, %v50_v19  ;;  %1802 = vmatpush3.bf16.msra.mxu1 %v1799_v18 }
   0xd   :  { %1678 = vmatprep.mubr.msk.f32.mxu0 %vm68_vm0, %v51_v20  ;;  %1806 = vmatpush3.bf16.msra.mxu0 %v1803_v39 }
   0xe   :  { %1808 = vmatprep.subr.bf16.mxu0 %v1807_v44 }
   0xf   :  { %1690 = vmatmul.mubr.msk.f32.vlgmr.msra.gmra.mrb[0].mxu1 %vm68_vm0, %v1972_v9 }
  0x10   :  { %1679 = vmatmul.mubr.msk.f32.gmra.mrb[2].mxu0 %vm68_vm0, %v52_v23  ;;  %1692 = vmatprep.mubr.msk.f32.mxu1 %vm68_vm0, %v1990_v14 }
  0x11   :  { %1703 = vmatprep.mubr.msk.f32.mxu0 %vm68_vm0, %v41_v5  ;;  %1810 = vmatpush3.bf16.msra.mxu0 %v1807_v44 }
  0x13   :  { %1693 = vmatmul.mubr.msk.f32.gmra.mrb[2].mxu1 %vm68_vm0, %v44_v21 }
  0x14   :  { %1704 = vmatmul.mubr.msk.f32.vlgmr.msra.gmra.mrb[4].mxu0 %vm68_vm0, %v1972_v9 }
  0x15   :  { %1706 = vmatprep.mubr.msk.f32.mxu0 %vm68_vm0, %v1990_v14 }
  0x18   :  { %1707 = vmatmul.mubr.msk.f32.gmra.mrb[6].mxu0 %vm68_vm0, %v44_v21 }
  0xdf   :  { %v1677_v25 = vpop.f32.mrb[0].mxu0 }
  0xe0   :  { %v147_v26 = vpop.f32.mrb[1].mxu0  ;;  %v153_v32 = vadd.f32 %v1677_v25, %v1538_v24 }
  0xe1   :  { %v148_v28 = vadd.f32 %v1538_v24, %v147_v26 }
  0xe2   :  { %v1691_v35 = vpop.f32.mrb[0].mxu1  ;;  %v618_v59 = vmul.f32 %v153_v32, %v2021_v27  ;;  %v619_v60 = vmul.f32 %v153_v32, %v2061_v50  ;;  %v620_v61 = vmul.f32 %v153_v32, %v2067_v52  ;;  %v621_v63 = vmul.f32 %v153_v32, %v2075_v56 }
  0xe3   :  { %368 = vrot.lane.b32.xlu0 %v148_v28, %s1884_s3  ;;  %v363_v29 = vmul.f32 %v148_v28, %v2021_v27  ;;  %v1680_v30 = vpop.f32.mrb[2].mxu0  ;;  %v255_v38 = vpop.f32.mrb[1].mxu1  ;;  %v2050_v49 = vadd.f32 %v1691_v35, %v1543_v40  ;;  %v364_v53 = vmul.f32 %v148_v28, %v2061_v50  ;;  %v365_v55 = vmul.f32 %v148_v28, %v2067_v52 }
  0xe4   :  { %v157_v31 = vpop.f32.mrb[3].mxu0  ;;  %v2027_v34 = vadd.f32 %v1680_v30, %v1538_v24  ;;  %v256_v48 = vadd.f32 %v1543_v40, %v255_v38  ;;  %v366_v58 = vmul.f32 %v148_v28, %v2075_v56 }
  0xe5   :  { %1711 = vmatprep.mubr.msk.f32.mxu1 %vm68_vm0, %v363_v29  ;;  %v2025_v33 = vadd.f32 %v1538_v24, %v157_v31 }
  0xe6   :  { %v1694_v43 = vpop.f32.mrb[2].mxu1  ;;  %1717 = vmatprep.subr.mxu0 %v256_v48  ;;  %v1126_v4 = vmul.f32 %v2027_v34, %v2021_v27  ;;  %v1127_v5 = vmul.f32 %v2027_v34, %v2061_v50  ;;  %v1128_v6 = vmul.f32 %v2027_v34, %v2067_v52  ;;  %v1129_v7 = vmul.f32 %v2027_v34, %v2075_v56 }
  0xe7   :  { %623 = vrot.lane.b32.xlu0 %v153_v32, %s1884_s3  ;;  %877 = vrot.lane.b32.xlu1 %v2025_v33, %s1884_s3  ;;  %v2046_v45 = vadd.f32 %v1694_v43, %v1543_v40  ;;  %v265_v46 = vpop.f32.mrb[3].mxu1  ;;  %v872_v0 = vmul.f32 %v2025_v33, %v2021_v27  ;;  %v873_v1 = vmul.f32 %v2025_v33, %v2061_v50 }
  0xe8   :  { %v2048_v47 = vadd.f32 %v1543_v40, %v265_v46  ;;  %1718 = vmatpush3.msra.mxu0 %v256_v48  ;;  %v874_v2 = vmul.f32 %v2025_v33, %v2067_v52  ;;  %v875_v3 = vmul.f32 %v2025_v33, %v2075_v56 }
  0xe9   :  { %1733 = vmatprep.subr.mxu0 %v2050_v49 }
  0xeb   :  { %1131 = vrot.lane.b32.xlu1 %v2027_v34, %s1884_s3 }
 0x155   :  { %v369_v51 = vpop.permute.xlu0 %368 }
 0x156   :  { %1709 = vmatprep.subr.msk.mxu1 %vm68_vm0, %v369_v51 }
 0x157   :  { %1710 = vmatpush3.xpose.msk.msra.mxu1 %vm68_vm0, %v369_v51 }
 0x159   :  { %v624_v54 = vpop.permute.xlu0 %623  ;;  %v878_v57 = vpop.permute.xlu1 %877 }
 0x15a   :  { %1712 = vmatmul.mubr.msk.f32.vlgmr.msra.gmra.mrb[4].mxu1 %vm68_vm0, %v364_v53  ;;  %1725 = vmatprep.subr.msk.mxu1 %vm68_vm0, %v624_v54 }
 0x15b   :  { %1714 = vmatprep.mubr.msk.f32.mxu1 %vm68_vm0, %v365_v55  ;;  %1726 = vmatpush3.xpose.msk.msra.mxu1 %vm68_vm0, %v624_v54 }
 0x15c   :  { %1741 = vmatprep.subr.msk.mxu1 %vm68_vm0, %v878_v57 }
 0x15d   :  { %v1132_v62 = vpop.permute.xlu1 %1131 }
 0x15e   :  { %1715 = vmatmul.mubr.msk.f32.gmra.mrb[6].mxu1 %vm68_vm0, %v366_v58 }
 0x15f   :  { %1727 = vmatprep.mubr.msk.f32.mxu1 %vm68_vm0, %v618_v59 }
 0x162   :  { %1728 = vmatmul.mubr.msk.f32.vlgmr.msra.gmra.mrb[8].mxu1 %vm68_vm0, %v619_v60 }
 0x163   :  { %1730 = vmatprep.mubr.msk.f32.mxu1 %vm68_vm0, %v620_v61  ;;  %1742 = vmatpush3.xpose.msk.msra.mxu1 %vm68_vm0, %v878_v57 }
 0x164   :  { %1757 = vmatprep.subr.msk.mxu1 %vm68_vm0, %v1132_v62 }
 0x166   :  { %1731 = vmatmul.mubr.msk.f32.gmra.mrb[10].mxu1 %vm68_vm0, %v621_v63 }
 0x167   :  { %1743 = vmatprep.mubr.msk.f32.mxu1 %vm68_vm0, %v872_v0 }
 0x16a   :  { %1744 = vmatmul.mubr.msk.f32.vlgmr.msra.gmra.mrb[12].mxu1 %vm68_vm0, %v873_v1 }
 0x16b   :  { %1758 = vmatpush3.xpose.msk.msra.mxu1 %vm68_vm0, %v1132_v62  ;;  %1746 = vmatprep.mubr.msk.f32.mxu1 %vm68_vm0, %v874_v2 }
 0x16e   :  { %1747 = vmatmul.mubr.msk.f32.gmra.mrb[14].mxu1 %vm68_vm0, %v875_v3 }
 0x16f   :  { %1759 = vmatprep.mubr.msk.f32.mxu1 %vm68_vm0, %v1126_v4 }
 0x172   :  { %1760 = vmatmul.mubr.msk.f32.vlgmr.msra.gmra.mrb[16].mxu1 %vm68_vm0, %v1127_v5 }
 0x173   :  { %1762 = vmatprep.mubr.msk.f32.mxu1 %vm68_vm0, %v1128_v6 }
 0x176   :  { %1763 = vmatmul.mubr.msk.f32.gmra.mrb[18].mxu1 %vm68_vm0, %v1129_v7 }
 0x22d   :  { %v1713_v8 = vpop.f32.mrb[4].mxu1 }
 0x22e   :  { %v450_v9 = vpop.f32.mrb[5].mxu1  ;;  %v473_v10 = vsel %vm469_vm1, %v1713_v8, -inf }
 0x22f   :  { %474 = vmax.xlane.f32.xlu1 %v473_v10  ;;  %v470_v11 = vsel %vm469_vm1, %v450_v9, -inf }
 0x230   :  { %471 = vmax.xlane.f32.xlu0 %v470_v11 }
 0x231   :  { %v1716_v12 = vpop.f32.mrb[6].mxu1 }
 0x232   :  { %v460_v13 = vpop.f32.mrb[7].mxu1  ;;  %v479_v18 = vsel %vm469_vm1, %v1716_v12, -inf }
 0x233   :  { %v476_v14 = vsel %vm469_vm1, %v460_v13, -inf }
 0x234   :  { %477 = vmax.xlane.f32.xlu0 %v476_v14 }
 0x235   :  { %v2122_v15 = vpop.f32.mrb[8].mxu1 }
 0x236   :  { %v705_v16 = vpop.f32.mrb[9].mxu1  ;;  %v727_v22 = vsel %vm469_vm1, %v2122_v15, -inf }
 0x237   :  { %v724_v17 = vsel %vm469_vm1, %v705_v16, -inf }
 0x238   :  { %725 = vmax.xlane.f32.xlu1 %v724_v17  ;;  %480 = vmax.xlane.f32.xlu0 %v479_v18 }
 0x239   :  { %v2126_v19 = vpop.f32.mrb[10].mxu1 }
 0x23a   :  { %v715_v20 = vpop.f32.mrb[11].mxu1  ;;  %v733_v26 = vsel %vm469_vm1, %v2126_v19, -inf }
 0x23b   :  { %v730_v21 = vsel %vm469_vm1, %v715_v20, -inf }
 0x23c   :  { %731 = vmax.xlane.f32.xlu1 %v730_v21  ;;  %728 = vmax.xlane.f32.xlu0 %v727_v22 }
 0x23d   :  { %v2131_v23 = vpop.f32.mrb[12].mxu1 }
 0x23e   :  { %v2133_v24 = vpop.f32.mrb[13].mxu1  ;;  %v981_v31 = vsel %vm469_vm1, %v2131_v23, -inf }
 0x23f   :  { %v978_v25 = vsel %vm469_vm1, %v2133_v24, -inf }
 0x240   :  { %979 = vmax.xlane.f32.xlu1 %v978_v25  ;;  %734 = vmax.xlane.f32.xlu0 %v733_v26 }
 0x241   :  { %v2139_v28 = vpop.f32.mrb[14].mxu1 }
 0x242   :  { %v2141_v29 = vpop.f32.mrb[15].mxu1  ;;  %v987_v35 = vsel %vm469_vm1, %v2139_v28, -inf }
 0x243   :  { %v984_v30 = vsel %vm469_vm1, %v2141_v29, -inf }
 0x244   :  { %985 = vmax.xlane.f32.xlu1 %v984_v30  ;;  %982 = vmax.xlane.f32.xlu0 %v981_v31 }
 0x245   :  { %v2147_v32 = vpop.f32.mrb[16].mxu1 }
 0x246   :  { %v2149_v33 = vpop.f32.mrb[17].mxu1  ;;  %v1235_v39 = vsel %vm469_vm1, %v2147_v32, -inf }
 0x247   :  { %v1232_v34 = vsel %vm469_vm1, %v2149_v33, -inf }
 0x248   :  { %1233 = vmax.xlane.f32.xlu1 %v1232_v34  ;;  %988 = vmax.xlane.f32.xlu0 %v987_v35 }
 0x249   :  { %v2155_v36 = vpop.f32.mrb[18].mxu1 }
 0x24a   :  { %v2157_v37 = vpop.f32.mrb[19].mxu1  ;;  %v1241_v40 = vsel %vm469_vm1, %v2155_v36, -inf }
 0x24b   :  { %v1238_v38 = vsel %vm469_vm1, %v2157_v37, -inf }
 0x24c   :  { %1239 = vmax.xlane.f32.xlu1 %v1238_v38  ;;  %1236 = vmax.xlane.f32.xlu0 %v1235_v39 }
 0x250   :  { %1242 = vmax.xlane.f32.xlu0 %v1241_v40 }
 0x2bc   :  { %v475_v41 = vpop.xlane.xlu1 %474 }
 0x2bd   :  { %v483_v42 = vsub.f32 %v1713_v8, %v475_v41  ;;  %v472_v43 = vpop.xlane.xlu0 %471 }
 0x2be   :  { %v482_v44 = vsub.f32 %v450_v9, %v472_v43 }
 0x2bf   :  { %v488_v46 = vmul.f32 1.442695, %v483_v42 }
 0x2c0   :  { %v486_v48 = vmul.f32 1.442695, %v482_v44 }
 0x2c1   :  { %1820 = vpow2.f32 %v488_v46  ;;  %v478_v51 = vpop.xlane.xlu0 %477 }
 0x2c2   :  { %1822 = vpow2.f32 %v486_v48  ;;  %v484_v53 = vsub.f32 %v460_v13, %v478_v51 }
 0x2c4   :  { %v490_v54 = vmul.f32 1.442695, %v484_v53 }
 0x2c5   :  { %v726_v55 = vpop.xlane.xlu1 %725  ;;  %v481_v57 = vpop.xlane.xlu0 %480 }
 0x2c6   :  { %1824 = vpow2.f32 %v490_v54  ;;  %v736_v58 = vsub.f32 %v705_v16, %v726_v55  ;;  %v485_v59 = vsub.f32 %v1716_v12, %v481_v57 }
 0x2c8   :  { %v740_v60 = vmul.f32 1.442695, %v736_v58  ;;  %v492_v61 = vmul.f32 1.442695, %v485_v59 }
 0x2c9   :  { %v732_v62 = vpop.xlane.xlu1 %731  ;;  %v729_v63 = vpop.xlane.xlu0 %728 }
 0x2ca   :  { %1826 = vpow2.f32 %v740_v60  ;;  %v738_v0 = vsub.f32 %v715_v20, %v732_v62  ;;  %v737_v1 = vsub.f32 %v2122_v15, %v729_v63 }
 0x2cb   :  { %v2166_v2 = vpop.eup %1820  ;;  %1828 = vpow2.f32 %v492_v61 }
 0x2cc   :  { %v2168_v3 = vpop.eup %1822  ;;  %v744_v4 = vmul.f32 1.442695, %v738_v0  ;;  %v742_v5 = vmul.f32 1.442695, %v737_v1  ;;  %v497_v6 = vsel %vm469_vm1, %v2166_v2, 0.0 }
 0x2cd   :  { %v980_v7 = vpop.xlane.xlu1 %979  ;;  %498 = vadd.xlane.f32.xlu0 %v497_v6  ;;  %v735_v8 = vpop.xlane.xlu0 %734  ;;  %v494_v9 = vsel %vm469_vm1, %v2168_v3, 0.0 }
 0x2ce   :  { %1830 = vpow2.f32 %v744_v4  ;;  %v990_v10 = vsub.f32 %v2133_v24, %v980_v7  ;;  %v739_v11 = vsub.f32 %v2126_v19, %v735_v8  ;;  %495 = vadd.xlane.f32.xlu1 %v494_v9  ;;  %v2239_v8 = vpop.f32.mrb[4].mxu0 }
 0x2cf   :  { %1832 = vpow2.f32 %v742_v5  ;;  %v2241_v9 = vpop.f32.mrb[5].mxu0 }
 0x2d0   :  { %v2176_v12 = vpop.eup %1824  ;;  %v994_v13 = vmul.f32 1.442695, %v990_v10  ;;  %v746_v14 = vmul.f32 1.442695, %v739_v11  ;;  %v2243_v10 = vpop.f32.mrb[6].mxu0 }
 0x2d1   :  { %v986_v15 = vpop.xlane.xlu1 %985  ;;  %v983_v16 = vpop.xlane.xlu0 %982  ;;  %v500_v17 = vsel %vm469_vm1, %v2176_v12, 0.0 }
 0x2d2   :  { %1834 = vpow2.f32 %v994_v13  ;;  %v992_v18 = vsub.f32 %v2141_v29, %v986_v15  ;;  %v991_v20 = vsub.f32 %v2131_v23, %v983_v16  ;;  %501 = vadd.xlane.f32.xlu1 %v500_v17  ;;  %v2245_v11 = vpop.f32.mrb[7].mxu0 }
 0x2d3   :  { %1836 = vpow2.f32 %v746_v14 }
 0x2d4   :  { %v2182_v21 = vpop.eup %1826  ;;  %v998_v19 = vmul.f32 1.442695, %v992_v18  ;;  %v996_v22 = vmul.f32 1.442695, %v991_v20 }
 0x2d5   :  { %v2184_v24 = vpop.eup %1828  ;;  %v1234_v25 = vpop.xlane.xlu1 %1233  ;;  %v748_v30 = vsel %vm469_vm1, %v2182_v21, 0.0 }
 0x2d6   :  { %v989_v26 = vpop.xlane.xlu0 %988  ;;  %1838 = vpow2.f32 %v998_v19  ;;  %v1244_v31 = vsub.f32 %v2149_v33, %v1234_v25  ;;  %749 = vadd.xlane.f32.xlu1 %v748_v30  ;;  %v503_v23 = vsel %vm469_vm1, %v2184_v24, 0.0 }
 0x2d7   :  { %v993_v29 = vsub.f32 %v2139_v28, %v989_v26  ;;  %1840 = vpow2.f32 %v996_v22  ;;  %504 = vadd.xlane.f32.xlu0 %v503_v23 }
 0x2d8   :  { %v2192_v34 = vpop.eup %1830  ;;  %v1248_v35 = vmul.f32 1.442695, %v1244_v31 }
 0x2d9   :  { %v1000_v38 = vmul.f32 1.442695, %v993_v29  ;;  %v2194_v39 = vpop.eup %1832  ;;  %v1240_v40 = vpop.xlane.xlu1 %1239  ;;  %v754_v42 = vsel %vm469_vm1, %v2192_v34, 0.0 }
 0x2da   :  { %v1237_v41 = vpop.xlane.xlu0 %1236  ;;  %1842 = vpow2.f32 %v1248_v35  ;;  %v1246_v28 = vsub.f32 %v2157_v37, %v1240_v40  ;;  %755 = vadd.xlane.f32.xlu1 %v754_v42  ;;  %v751_v43 = vsel %vm469_vm1, %v2194_v39, 0.0 }
 0x2db   :  { %v1245_v33 = vsub.f32 %v2147_v32, %v1237_v41  ;;  %1844 = vpow2.f32 %v1000_v38  ;;  %752 = vadd.xlane.f32.xlu0 %v751_v43 }
 0x2dc   :  { %v2202_v44 = vpop.eup %1834  ;;  %v1252_v46 = vmul.f32 1.442695, %v1246_v28 }
 0x2dd   :  { %v1250_v48 = vmul.f32 1.442695, %v1245_v33  ;;  %v2204_v51 = vpop.eup %1836  ;;  %v1002_v54 = vsel %vm469_vm1, %v2202_v44, 0.0 }
 0x2de   :  { %v1243_v53 = vpop.xlane.xlu0 %1242  ;;  %1846 = vpow2.f32 %v1252_v46  ;;  %1003 = vadd.xlane.f32.xlu1 %v1002_v54  ;;  %v757_v32 = vsel %vm469_vm1, %v2204_v51, 0.0 }
 0x2df   :  { %v1247_v37 = vsub.f32 %v2155_v36, %v1243_v53  ;;  %1848 = vpow2.f32 %v1250_v48  ;;  %758 = vadd.xlane.f32.xlu0 %v757_v32 }
 0x2e0   :  { %v2211_v55 = vpop.eup %1838 }
 0x2e1   :  { %v1254_v57 = vmul.f32 1.442695, %v1247_v37  ;;  %v2213_v58 = vpop.eup %1840  ;;  %v1008_v59 = vsel %vm469_vm1, %v2211_v55, 0.0 }
 0x2e2   :  { %1009 = vadd.xlane.f32.xlu1 %v1008_v59  ;;  %v1005_v60 = vsel %vm469_vm1, %v2213_v58, 0.0 }
 0x2e3   :  { %1850 = vpow2.f32 %v1254_v57  ;;  %1006 = vadd.xlane.f32.xlu0 %v1005_v60 }
 0x2e4   :  { %v2219_v36 = vpop.eup %1842 }
 0x2e5   :  { %v2221_v61 = vpop.eup %1844  ;;  %v1256_v62 = vsel %vm469_vm1, %v2219_v36, 0.0 }
 0x2e6   :  { %1257 = vadd.xlane.f32.xlu1 %v1256_v62  ;;  %v1011_v63 = vsel %vm469_vm1, %v2221_v61, 0.0 }
 0x2e7   :  { %1012 = vadd.xlane.f32.xlu0 %v1011_v63 }
 0x2e8   :  { %v2227_v0 = vpop.eup %1846 }
 0x2e9   :  { %v2229_v1 = vpop.eup %1848  ;;  %v1262_v4 = vsel %vm469_vm1, %v2227_v0, 0.0 }
 0x2ea   :  { %1263 = vadd.xlane.f32.xlu1 %v1262_v4  ;;  %v1259_v5 = vsel %vm469_vm1, %v2229_v1, 0.0  ;;  %v1383_v4 = vld [vmem:[%s2353_s8 + $0x18] sm:$0xff] }
 0x2eb   :  { %1260 = vadd.xlane.f32.xlu0 %v1259_v5 }
 0x2ed   :  { %v2235_v6 = vpop.eup %1850 }
 0x2ee   :  { %v1265_v7 = vsel %vm469_vm1, %v2235_v6, 0.0 }
 0x2ef   :  { %1266 = vadd.xlane.f32.xlu0 %v1265_v7 }
 0x35a   :  { %v499_v13 = vpop.xlane.xlu0 %498 }
 0x35b   :  { %1852 = vrcp.f32 %v499_v13  ;;  %v496_v14 = vpop.xlane.xlu1 %495 }
 0x35c   :  { %1854 = vrcp.f32 %v496_v14 }
 0x35f   :  { %v502_v15 = vpop.xlane.xlu1 %501 }
 0x360   :  { %1856 = vrcp.f32 %v502_v15 }
 0x363   :  { %v750_v16 = vpop.xlane.xlu1 %749 }
 0x364   :  { %1858 = vrcp.f32 %v750_v16  ;;  %v505_v17 = vpop.xlane.xlu0 %504 }
 0x365   :  { %v1853_v18 = vpop.eup %1852  ;;  %1860 = vrcp.f32 %v505_v17 }
 0x366   :  { %v1855_v20 = vpop.eup %1854  ;;  %v509_v25 = vmul.f32 %v1853_v18, %v2166_v2 }
 0x367   :  { %v756_v19 = vpop.xlane.xlu1 %755  ;;  %v507_v22 = vmul.f32 %v1855_v20, %v2168_v3 }
 0x368   :  { %1862 = vrcp.f32 %v756_v19  ;;  %v753_v26 = vpop.xlane.xlu0 %752 }
 0x369   :  { %1864 = vrcp.f32 %v753_v26  ;;  %1719 = vmatprep.mubr.msk.f32.mxu0 %vm469_vm1, %v507_v22 }
 0x36a   :  { %v1857_v30 = vpop.eup %1856  ;;  %1720 = vmatmul.mubr.msk.f32.vlgmr.msra.gmra.mrb[8].mxu0 %vm469_vm1, %v509_v25 }
 0x36b   :  { %1734 = vmatpush3.msra.mxu0 %v2050_v49  ;;  %v1004_v31 = vpop.xlane.xlu1 %1003  ;;  %v511_v29 = vmul.f32 %v1857_v30, %v2176_v12 }
 0x36c   :  { %1866 = vrcp.f32 %v1004_v31  ;;  %1749 = vmatprep.subr.mxu0 %v2048_v47  ;;  %v759_v23 = vpop.xlane.xlu0 %758 }
 0x36d   :  { %1868 = vrcp.f32 %v759_v23  ;;  %1722 = vmatprep.mubr.msk.f32.mxu0 %vm469_vm1, %v511_v29 }
 0x36e   :  { %v1859_v2 = vpop.eup %1858 }
 0x36f   :  { %v1861_v3 = vpop.eup %1860  ;;  %v1010_v35 = vpop.xlane.xlu1 %1009  ;;  %v761_v38 = vmul.f32 %v1859_v2, %v2182_v21 }
 0x370   :  { %1870 = vrcp.f32 %v1010_v35  ;;  %v1007_v40 = vpop.xlane.xlu0 %1006  ;;  %v513_v41 = vmul.f32 %v1861_v3, %v2184_v24 }
 0x371   :  { %1872 = vrcp.f32 %v1007_v40 }
 0x372   :  { %v1863_v49 = vpop.eup %1862  ;;  %1723 = vmatmul.mubr.msk.f32.gmra.mrb[10].mxu0 %vm469_vm1, %v513_v41 }
 0x373   :  { %v1865_v12 = vpop.eup %1864  ;;  %1735 = vmatprep.mubr.msk.f32.mxu0 %vm469_vm1, %v761_v38  ;;  %v1258_v42 = vpop.xlane.xlu1 %1257  ;;  %v765_v28 = vmul.f32 %v1863_v49, %v2192_v34 }
 0x374   :  { %v763_v33 = vmul.f32 %v1865_v12, %v2194_v39  ;;  %1874 = vrcp.f32 %v1258_v42  ;;  %v1013_v43 = vpop.xlane.xlu0 %1012 }
 0x375   :  { %1876 = vrcp.f32 %v1013_v43 }
 0x376   :  { %v1867_v21 = vpop.eup %1866  ;;  %1736 = vmatmul.mubr.msk.f32.vlgmr.msra.gmra.mrb[12].mxu0 %vm469_vm1, %v763_v33 }
 0x377   :  { %v1869_v46 = vpop.eup %1868  ;;  %1750 = vmatpush3.msra.mxu0 %v2048_v47  ;;  %1738 = vmatprep.mubr.msk.f32.mxu0 %vm469_vm1, %v765_v28  ;;  %v1264_v24 = vpop.xlane.xlu1 %1263  ;;  %v1015_v48 = vmul.f32 %v1867_v21, %v2202_v44 }
 0x378   :  { %1765 = vmatprep.subr.mxu0 %v2046_v45  ;;  %1878 = vrcp.f32 %v1264_v24  ;;  %v1261_v34 = vpop.xlane.xlu0 %1260  ;;  %v767_v39 = vmul.f32 %v1869_v46, %v2204_v51 }
 0x379   :  { %1880 = vrcp.f32 %v1261_v34 }
 0x37a   :  { %v1871_v53 = vpop.eup %1870  ;;  %1739 = vmatmul.mubr.msk.f32.gmra.mrb[14].mxu0 %vm469_vm1, %v767_v39 }
 0x37b   :  { %v1873_v54 = vpop.eup %1872  ;;  %1751 = vmatprep.mubr.msk.f32.mxu0 %vm469_vm1, %v1015_v48  ;;  %v1019_v47 = vmul.f32 %v1871_v53, %v2211_v55 }
 0x37c   :  { %v1017_v37 = vmul.f32 %v1873_v54, %v2213_v58  ;;  %v1267_v32 = vpop.xlane.xlu0 %1266 }
 0x37d   :  { %1882 = vrcp.f32 %v1267_v32 }
 0x37e   :  { %v1875_v44 = vpop.eup %1874  ;;  %1752 = vmatmul.mubr.msk.f32.vlgmr.msra.gmra.mrb[16].mxu0 %vm469_vm1, %v1017_v37 }
 0x37f   :  { %v1877_v57 = vpop.eup %1876  ;;  %1766 = vmatpush3.msra.mxu0 %v2046_v45  ;;  %1754 = vmatprep.mubr.msk.f32.mxu0 %vm469_vm1, %v1019_v47  ;;  %v1269_v51 = vmul.f32 %v1875_v44, %v2219_v36  ;;  %v1380_v36 = vld [vmem:[%s2353_s8] sm:$0xff] }
 0x380   :  { %v1021_v59 = vmul.f32 %v1877_v57, %v2221_v61  ;;  %v1381_v61 = vld [vmem:[%s2353_s8 + $0x8] sm:$0xff] }
 0x382   :  { %v1879_v60 = vpop.eup %1878  ;;  %1755 = vmatmul.mubr.msk.f32.gmra.mrb[18].mxu0 %vm469_vm1, %v1021_v59 }
 0x383   :  { %v1881_v55 = vpop.eup %1880  ;;  %1767 = vmatprep.mubr.msk.f32.mxu0 %vm469_vm1, %v1269_v51  ;;  %v1273_v58 = vmul.f32 %v1879_v60, %v2227_v0  ;;  %v1811_v0 = vpack.c.bf16 %v1381_v61, %v1380_v36 }
 0x384   :  { %v1271_v62 = vmul.f32 %v1881_v55, %v2229_v1  ;;  %v1382_v1 = vld [vmem:[%s2353_s8 + $0x10] sm:$0xff] }
 0x385   :  { %1812 = vmatprep.subr.bf16.mxu1 %v1811_v0  ;;  %v1815_v5 = vpack.c.bf16 %v1383_v4, %v1382_v1 }
 0x386   :  { %1768 = vmatmul.mubr.msk.f32.vlgmr.msra.gmra.mrb[20].mxu0 %vm469_vm1, %v1271_v62  ;;  %1814 = vmatpush3.bf16.msra.mxu1 %v1811_v0 }
 0x387   :  { %v1883_v63 = vpop.eup %1882  ;;  %1770 = vmatprep.mubr.msk.f32.mxu0 %vm469_vm1, %v1273_v58  ;;  %1816 = vmatprep.subr.bf16.mxu1 %v1815_v5  ;;  %v1593_v58 = vld [vmem:[%s2355_s10] ss:$0 sm:$0xff] }
 0x388   :  { %v1275_v45 = vmul.f32 %v1883_v63, %v2235_v6 }
 0x38a   :  { %1771 = vmatmul.mubr.msk.f32.gmra.mrb[22].mxu0 %vm469_vm1, %v1275_v45  ;;  %1818 = vmatpush3.bf16.msra.mxu1 %v1815_v5 }
 0x43d   :  { %v1721_v6 = vpop.f32.mrb[8].mxu0 }
 0x43e   :  { %v612_v7 = vmul.f32 %v1721_v6, %v2061_v50  ;;  %v592_v13 = vpop.f32.mrb[9].mxu0 }
 0x43f   :  { %v611_v14 = vmul.f32 %v592_v13, %v2021_v27 }
 0x441   :  { %v615_v15 = vadd.f32 %v612_v7, %v611_v14 }
 0x445   :  { %v1724_v16 = vpop.f32.mrb[10].mxu0 }
 0x446   :  { %v602_v17 = vpop.f32.mrb[11].mxu0  ;;  %v614_v20 = vmul.f32 %v1724_v16, %v2075_v56 }
 0x447   :  { %v613_v18 = vmul.f32 %v602_v17, %v2067_v52 }
 0x449   :  { %v616_v19 = vadd.f32 %v615_v15, %v613_v18  ;;  %v1737_v22 = vpop.f32.mrb[12].mxu0 }
 0x44a   :  { %v866_v25 = vmul.f32 %v1737_v22, %v2061_v50  ;;  %v846_v26 = vpop.f32.mrb[13].mxu0 }
 0x44b   :  { %v617_v30 = vadd.f32 %v616_v19, %v614_v20  ;;  %v865_v31 = vmul.f32 %v846_v26, %v2021_v27 }
 0x44d   :  { %v869_v29 = vadd.f32 %v866_v25, %v865_v31  ;;  %v1740_v23 = vpop.f32.mrb[14].mxu0  ;;  %1781 = vmatprep.mubr.msk.f32.mxu1 %vm68_vm0, %v617_v30 }
 0x44e   :  { %v856_v2 = vpop.f32.mrb[15].mxu0  ;;  %v868_v35 = vmul.f32 %v1740_v23, %v2075_v56 }
 0x44f   :  { %v867_v3 = vmul.f32 %v856_v2, %v2067_v52 }
 0x451   :  { %v870_v38 = vadd.f32 %v869_v29, %v867_v3  ;;  %v1753_v40 = vpop.f32.mrb[16].mxu0 }
 0x452   :  { %v1120_v41 = vmul.f32 %v1753_v40, %v2061_v50  ;;  %v1100_v49 = vpop.f32.mrb[17].mxu0 }
 0x453   :  { %v871_v12 = vadd.f32 %v870_v38, %v868_v35  ;;  %v1119_v42 = vmul.f32 %v1100_v49, %v2021_v27 }
 0x455   :  { %v1123_v28 = vadd.f32 %v1120_v41, %v1119_v42  ;;  %v1756_v33 = vpop.f32.mrb[18].mxu0  ;;  %1782 = vmatmul.mubr.msk.f32.vlgmr.msra.gmra.mrb[20].mxu1 %vm68_vm0, %v871_v12 }
 0x456   :  { %v1110_v43 = vpop.f32.mrb[19].mxu0  ;;  %v1122_v46 = vmul.f32 %v1756_v33, %v2075_v56 }
 0x457   :  { %v1121_v21 = vmul.f32 %v1110_v43, %v2067_v52 }
 0x459   :  { %v1124_v24 = vadd.f32 %v1123_v28, %v1121_v21  ;;  %v1769_v48 = vpop.f32.mrb[20].mxu0 }
 0x45a   :  { %v1374_v34 = vmul.f32 %v1769_v48, %v2061_v50  ;;  %v1354_v39 = vpop.f32.mrb[21].mxu0  ;;  %v1592_v50 = vld [vmem:[%s2354_s9] ss:$0 sm:$0xff] }
 0x45b   :  { %v1125_v53 = vadd.f32 %v1124_v24, %v1122_v46  ;;  %v1373_v54 = vmul.f32 %v1354_v39, %v2021_v27 }
 0x45d   :  { %v1377_v47 = vadd.f32 %v1374_v34, %v1373_v54  ;;  %v1772_v37 = vpop.f32.mrb[22].mxu0  ;;  %1784 = vmatprep.mubr.msk.f32.mxu1 %vm68_vm0, %v1125_v53 }
 0x45e   :  { %v1364_v32 = vpop.f32.mrb[23].mxu0  ;;  %v1376_v57 = vmul.f32 %v1772_v37, %v2075_v56  ;;  %v1594_v56 = vld [vmem:[%s2356_s11] ss:$0 sm:$0xff] }
 0x45f   :  { %v1375_v44 = vmul.f32 %v1364_v32, %v2067_v52 }
 0x461   :  { %v1378_v51 = vadd.f32 %v1377_v47, %v1375_v44 }
 0x463   :  { %v1379_v59 = vadd.f32 %v1378_v51, %v1376_v57 }
 0x465   :  { %1785 = vmatmul.mubr.msk.f32.gmra.mrb[22].mxu1 %vm68_vm0, %v1379_v59 }
 0x528   :  { %v1783_v60 = vpop.f32.mrb[20].mxu1 }
 0x529   :  { %v1482_v27 = vsub.f32 %v2239_v8, %v1783_v60  ;;  %v1462_v55 = vpop.f32.mrb[21].mxu1 }
 0x52a   :  { %v1481_v52 = vsub.f32 %v2241_v9, %v1462_v55 }
 0x52b   :  { %v1493_v62 = vsub.f32 %v1482_v27, %v1592_v50 }
 0x52c   :  { %v1492_v63 = vsub.f32 %v1481_v52, %v1592_v50 }
 0x52d   :  { %v1504_v45 = vmul.f32 %v1593_v58, %v1493_v62 }
 0x52e   :  { %v1503_v36 = vmul.f32 %v1593_v58, %v1492_v63 }
 0x52f   :  { %v1515_v61 = vadd.f32 %v1594_v56, %v1504_v45 }
 0x530   :  { %v1514_v0 = vadd.f32 %v1594_v56, %v1503_v36 }
 0x531   :  { %vm1519_vm2 = vcmp.ge.f32.partialorder %v1515_v61, 0.0  ;;  %v1523_v1 = vmul.f32 0.2, %v1515_v61 }
 0x532   :  { %vm1518_vm3 = vcmp.ge.f32.partialorder %v1514_v0, 0.0  ;;  %v1522_v8 = vmul.f32 0.2, %v1514_v0 }
 0x533   :  { %v1527_v4 = vsel %vm1519_vm2, %v1515_v61, %v1523_v1 }
 0x534   :  { %1531 = vst.msk [vmem:[%s2357_s12 + $0x8] sm:$0xff] %vm68_vm0, %v1527_v4  ;;  %v1526_v9 = vsel %vm1518_vm3, %v1514_v0, %v1522_v8 }
 0x535   :  { %1530 = vst.msk [vmem:[%s2357_s12] sm:$0xff] %vm68_vm0, %v1526_v9 }
 0x538   :  { %v1786_v5 = vpop.f32.mrb[22].mxu1 }
 0x539   :  { %v1484_v6 = vsub.f32 %v2243_v10, %v1786_v5  ;;  %v1472_v7 = vpop.f32.mrb[23].mxu1 }
 0x53a   :  { %v1483_v13 = vsub.f32 %v2245_v11, %v1472_v7 }
 0x53b   :  { %v1495_v14 = vsub.f32 %v1484_v6, %v1592_v50 }
 0x53c   :  { %v1494_v15 = vsub.f32 %v1483_v13, %v1592_v50 }
 0x53d   :  { %v1506_v16 = vmul.f32 %v1593_v58, %v1495_v14 }
 0x53e   :  { %v1505_v17 = vmul.f32 %v1593_v58, %v1494_v15 }
 0x53f   :  { %v1517_v18 = vadd.f32 %v1594_v56, %v1506_v16 }
 0x540   :  { %v1516_v20 = vadd.f32 %v1594_v56, %v1505_v17 }
 0x541   :  { %vm1521_vm4 = vcmp.ge.f32.partialorder %v1517_v18, 0.0  ;;  %v1525_v19 = vmul.f32 0.2, %v1517_v18 }
 0x542   :  { %vm1520_vm5 = vcmp.ge.f32.partialorder %v1516_v20, 0.0  ;;  %v1524_v22 = vmul.f32 0.2, %v1516_v20 }
 0x543   :  { %v1529_v25 = vsel %vm1521_vm4, %v1517_v18, %v1525_v19 }
 0x544   :  { %1533 = vst.msk [vmem:[%s2357_s12 + $0x18] sm:$0xff] %vm68_vm0, %v1529_v25  ;;  %v1528_v10 = vsel %vm1520_vm5, %v1516_v20, %v1524_v22 }
 0x545   :  { %1532 = vst.msk [vmem:[%s2357_s12 + $0x10] sm:$0xff] %vm68_vm0, %v1528_v10 }

</bundles_post_ra>
